<compile_context>
chip_gen: v6e
topology: v6e:2x2x1
jax: 0.10.0
libtpu: 0.0.40
codegen_flags: <defaults>
</compile_context>

<pallas_src>
import jax
import jax.numpy as jnp
from jax.experimental import pallas as pl
from jax.experimental.pallas import tpu as pltpu


def _linear_sigmoid_logsoftmax_kernel(x_ref, w_ref, b_ref, o_ref):
    # x_ref: (TB, 784), w_ref: (784, 10), b_ref: (1, 10), o_ref: (TB, 10)
    x = x_ref[...]
    w = w_ref[...]
    b = b_ref[...]

    # Linear layer on the MXU (f32 accumulation).
    y = jnp.dot(x, w, preferred_element_type=jnp.float32) + b

    # Sigmoid (EUP exp + reciprocal).
    s = jax.nn.sigmoid(y)

    # log_softmax over dim=1. s is in (0, 1) so exp(s) cannot overflow and the
    # usual max-subtraction is unnecessary (saves one cross-lane reduce).
    lse = jnp.log(jnp.sum(jnp.exp(s), axis=1, keepdims=True))
    o_ref[...] = (s - lse).astype(o_ref.dtype)


def _round_up(v, m):
    return ((v + m - 1) // m) * m


def linear_sigmoid_forward(x, w_t, b, *, max_tile_rows=2048):
    """x: any shape whose total size is a multiple of 784 (torch .view(-1, 784)).

    w_t: (784, 10) transposed weight, b: (10,) bias. Returns (B, 10) float32.
    """
    assert x.size % 784 == 0, f"input size {x.size} is not a multiple of 784"
    x2d = x.reshape(-1, 784)
    B = x2d.shape[0]
    b2d = b.reshape(1, 10)

    # Batch tile: multiple of 8 sublanes, capped so mid/large batches split
    # into >= 2 grid steps (v7x megacore), and at max_tile_rows overall.
    TB = max(8, min(max_tile_rows, _round_up(pl.cdiv(B, 2), 8)))
    grid = (pl.cdiv(B, TB),)  # ragged last block is masked by Pallas

    x_bytes = B * 784 * x2d.dtype.itemsize
    cost = pl.CostEstimate(
        flops=2 * B * 784 * 10,
        # sigmoid: exp + reciprocal; softmax: exp + log  -> ~4 per output elem.
        transcendentals=4 * B * 10,
        bytes_accessed=x_bytes + 784 * 10 * 4 + 10 * 4 + B * 10 * 4,
    )

    out = pl.pallas_call(
        _linear_sigmoid_logsoftmax_kernel,
        out_shape=jax.ShapeDtypeStruct((B, 10), jnp.float32),
        grid=grid,
        in_specs=[
            # Streamed activations (default double buffering).
            pl.BlockSpec((TB, 784), lambda i: (i, 0)),
            # VMEM-resident weight / bias: constant index_map, single buffer.
            pl.BlockSpec((784, 10), lambda i: (0, 0),
                         pipeline_mode=pl.Buffered(buffer_count=1)),
            pl.BlockSpec((1, 10), lambda i: (0, 0),
                         pipeline_mode=pl.Buffered(buffer_count=1)),
        ],
        out_specs=pl.BlockSpec((TB, 10), lambda i: (i, 0)),
        compiler_params=pltpu.CompilerParams(
            dimension_semantics=("parallel",),
            vmem_limit_bytes=32 * 1024 * 1024,
        ),
        cost_estimate=cost,
    )(x2d, w_t, b2d)

    return out


if __name__ == "__main__":
    key = jax.random.PRNGKey(0)
    kx, kw, kb = jax.random.split(key, 3)

    # Deterministic parameters (nn.Linear(784, 10) shapes: W (10, 784), b (10,)).
    bound = 1.0 / jnp.sqrt(784.0)
    w = jax.random.uniform(kw, (10, 784), jnp.float32, -bound, bound)
    b = jax.random.uniform(kb, (10,), jnp.float32, -bound, bound)
    w_t = w.T  # (784, 10) so the kernel computes x @ W^T

    # Small MNIST-like input batch (NCHW).
    x = jax.random.normal(kx, (8, 1, 28, 28), jnp.float32)

    out = linear_sigmoid_forward(x, w_t, b)
    out = jax.block_until_ready(out)

    # Reference check in plain JAX.
    y_ref = x.reshape(-1, 784) @ w.T + b
    s_ref = jax.nn.sigmoid(y_ref)
    ref = jax.nn.log_softmax(s_ref, axis=1)
    assert out.shape == (8, 10)
    assert jnp.allclose(out, ref, atol=1e-5, rtol=1e-5)

    print("KERNEL_OK")
</pallas_src>

<mosaic_0001>
module attributes {stable_mosaic.version = 11 : i64} {
  func.func @_linear_sigmoid_logsoftmax_kernel(%arg0: i32, %arg1: memref<8x784xf32, #tpu.memory_space<vmem>>, %arg2: memref<784x10xf32, #tpu.memory_space<vmem>>, %arg3: memref<1x10xf32, #tpu.memory_space<vmem>>, %arg4: memref<8x10xf32, #tpu.memory_space<vmem>>) attributes {dimension_semantics = [#tpu.dimension_semantics<parallel>], iteration_bounds = array<i64: 1>, scalar_prefetch = 0 : i64, scratch_operands = 0 : i64, tpu.core_type = #tpu.core_type<tc>, window_params = [{transform_indices = @transform_0, window_bounds = array<i64: 8, 784>}, {pipeline_mode = #tpu.pipeline_mode<synchronous>, transform_indices = @transform_1, window_bounds = array<i64: 784, 10>}, {pipeline_mode = #tpu.pipeline_mode<synchronous>, transform_indices = @transform_2, window_bounds = array<i64: 1, 10>}, {transform_indices = @transform_3, window_bounds = array<i64: 8, 10>}]} {
    %c0 = arith.constant 0 : index
    %c0_0 = arith.constant 0 : index
    %0 = vector.load %arg1[%c0, %c0_0] : memref<8x784xf32, #tpu.memory_space<vmem>>, vector<8x784xf32>
    %c0_1 = arith.constant 0 : index
    %c0_2 = arith.constant 0 : index
    %1 = vector.load %arg2[%c0_1, %c0_2] : memref<784x10xf32, #tpu.memory_space<vmem>>, vector<784x10xf32>
    %c0_3 = arith.constant 0 : index
    %c0_4 = arith.constant 0 : index
    %2 = vector.load %arg3[%c0_3, %c0_4] : memref<1x10xf32, #tpu.memory_space<vmem>>, vector<1x10xf32>
    %cst = arith.constant dense<0.000000e+00> : vector<8x10xf32>
    %3 = tpu.matmul %0, %1, %cst {dimension_numbers = #tpu.dot_dimension_numbers<[1], [0], [0], [1], [0, 0, 1, 1], [], []>} : vector<8x784xf32>, vector<784x10xf32>, vector<8x10xf32> -> vector<8x10xf32>
    %4 = vector.broadcast %2 : vector<1x10xf32> to vector<8x10xf32>
    %5 = arith.addf %3, %4 : vector<8x10xf32>
    %6 = arith.negf %5 : vector<8x10xf32>
    %7 = math.exp %6 : vector<8x10xf32>
    %cst_5 = arith.constant 1.000000e+00 : f32
    %8 = vector.broadcast %cst_5 : f32 to vector<8x10xf32>
    %9 = arith.addf %8, %7 : vector<8x10xf32>
    %10 = arith.divf %8, %9 : vector<8x10xf32>
    %11 = math.exp %10 : vector<8x10xf32>
    %cst_6 = arith.constant dense<0.000000e+00> : vector<8xf32>
    %12 = vector.multi_reduction <add>, %11, %cst_6 [1] : vector<8x10xf32> to vector<8xf32>
    %13 = vector.shape_cast %12 : vector<8xf32> to vector<8x1xf32>
    %14 = math.log %13 : vector<8x1xf32>
    %15 = vector.broadcast %14 : vector<8x1xf32> to vector<8x10xf32>
    %16 = arith.subf %10, %15 : vector<8x10xf32>
    %c0_7 = arith.constant 0 : index
    %c0_8 = arith.constant 0 : index
    %17 = vector.load %arg4[%c0_7, %c0_8] : memref<8x10xf32, #tpu.memory_space<vmem>>, vector<8x10xf32>
    tpu.vector_store %arg4[%c0_7, %c0_8], %16 {strides = array<i32>} : memref<8x10xf32, #tpu.memory_space<vmem>>, vector<8x10xf32>,
    return
  }
  func.func @transform_0(%arg0: i32) -> (i32, i32) {
    %c0_i32 = arith.constant 0 : i32
    %c0_i32_0 = arith.constant 0 : i32
    return %arg0, %c0_i32 : i32, i32
  }
  func.func @transform_1(%arg0: i32) -> (i32, i32) {
    %c0_i32 = arith.constant 0 : i32
    %c0_i32_0 = arith.constant 0 : i32
    %c0_i32_1 = arith.constant 0 : i32
    return %c0_i32, %c0_i32_0 : i32, i32
  }
  func.func @transform_2(%arg0: i32) -> (i32, i32) {
    %c0_i32 = arith.constant 0 : i32
    %c0_i32_0 = arith.constant 0 : i32
    %c0_i32_1 = arith.constant 0 : i32
    return %c0_i32, %c0_i32_0 : i32, i32
  }
  func.func @transform_3(%arg0: i32) -> (i32, i32) {
    %c0_i32 = arith.constant 0 : i32
    %c0_i32_0 = arith.constant 0 : i32
    return %arg0, %c0_i32 : i32, i32
  }
}

</mosaic_0001>

<bundles_post_ra>
// kernel: tpu_custom_call.1
= control target key start
LH: loop header
LB: loop body
LE: loop exit
PB: predicated region body
PF: predicated region fallthrough
CT: control target
= control target key end

     0   :  { %s936_s0 = inlined_call_operand.vmem [shape: f32[8,784], index: 0, kind: input, shape index: {}]   ;;  %s937_s1 = inlined_call_operand.vmem [shape: f32[784,10], index: 1, kind: input, shape index: {}]   ;;  %s938_s2 = inlined_call_operand.vmem [shape: f32[1,10], index: 2, kind: input, shape index: {}]   ;;  %s939_s3 = inlined_call_operand.hbm [shape: f32[8,10], index: 3, kind: output, shape index: {}]  }
   0x1   :  { %v53_v0 = vld [vmem:[%s937_s1 + $0xf8] sm:$0xff]  ;;  %v52_v2 = vld [vmem:[%s937_s1 + $0xf0] sm:$0xff]  ;;  %v51_v6 = vld [vmem:[%s937_s1 + $0xe8] sm:$0xff] }
   0x2   :  { %v37_v1 = vld [vmem:[%s937_s1 + $0x78] sm:$0xff]  ;;  %444 = vmatprep.subr.mxu0 %v53_v0  ;;  %v36_v4 = vld [vmem:[%s937_s1 + $0x70] sm:$0xff]  ;;  %v35_v8 = vld [vmem:[%s937_s1 + $0x68] sm:$0xff] }
   0x3   :  { %v85_v3 = vld [vmem:[%s937_s1 + $0x1f8] sm:$0xff]  ;;  %445 = vmatpush3.msra.mxu0 %v37_v1  ;;  %v84_v7 = vld [vmem:[%s937_s1 + $0x1f0] sm:$0xff]  ;;  %v83_v10 = vld [vmem:[%s937_s1 + $0x1e8] sm:$0xff] }
   0x4   :  { %v69_v5 = vld [vmem:[%s937_s1 + $0x178] sm:$0xff]  ;;  %479 = vmatprep.subr.mxu1 %v85_v3  ;;  %446 = vmatprep.subr.mxu0 %v52_v2  ;;  %v68_v9 = vld [vmem:[%s937_s1 + $0x170] sm:$0xff]  ;;  %v50_v11 = vld [vmem:[%s937_s1 + $0xe0] sm:$0xff] }
   0x5   :  { %480 = vmatpush3.msra.mxu1 %v69_v5  ;;  %447 = vmatpush3.msra.mxu0 %v36_v4  ;;  %v67_v12 = vld [vmem:[%s937_s1 + $0x168] sm:$0xff]  ;;  %v34_v13 = vld [vmem:[%s937_s1 + $0x60] sm:$0xff]  ;;  %v49_v15 = vld [vmem:[%s937_s1 + $0xd8] sm:$0xff] }
   0x6   :  { %481 = vmatprep.subr.mxu1 %v84_v7  ;;  %448 = vmatprep.subr.mxu0 %v51_v6  ;;  %v82_v14 = vld [vmem:[%s937_s1 + $0x1e0] sm:$0xff]  ;;  %v33_v17 = vld [vmem:[%s937_s1 + $0x58] sm:$0xff]  ;;  %v48_v19 = vld [vmem:[%s937_s1 + $0xd0] sm:$0xff] }
   0x7   :  { %482 = vmatpush3.msra.mxu1 %v68_v9  ;;  %449 = vmatpush3.msra.mxu0 %v35_v8  ;;  %v66_v16 = vld [vmem:[%s937_s1 + $0x160] sm:$0xff]  ;;  %v81_v18 = vld [vmem:[%s937_s1 + $0x1d8] sm:$0xff]  ;;  %v32_v21 = vld [vmem:[%s937_s1 + $0x50] sm:$0xff] }
   0x8   :  { %483 = vmatprep.subr.mxu1 %v83_v10  ;;  %450 = vmatprep.subr.mxu0 %v50_v11  ;;  %v65_v20 = vld [vmem:[%s937_s1 + $0x158] sm:$0xff]  ;;  %v80_v22 = vld [vmem:[%s937_s1 + $0x1d0] sm:$0xff]  ;;  %v47_v23 = vld [vmem:[%s937_s1 + $0xc8] sm:$0xff] }
   0x9   :  { %484 = vmatpush3.msra.mxu1 %v67_v12  ;;  %451 = vmatpush3.msra.mxu0 %v34_v13  ;;  %v64_v24 = vld [vmem:[%s937_s1 + $0x150] sm:$0xff]  ;;  %v31_v25 = vld [vmem:[%s937_s1 + $0x48] sm:$0xff]  ;;  %v46_v27 = vld [vmem:[%s937_s1 + $0xc0] sm:$0xff] }
   0xa   :  { %485 = vmatprep.subr.mxu1 %v82_v14  ;;  %452 = vmatprep.subr.mxu0 %v49_v15  ;;  %v79_v26 = vld [vmem:[%s937_s1 + $0x1c8] sm:$0xff]  ;;  %v30_v29 = vld [vmem:[%s937_s1 + $0x40] sm:$0xff]  ;;  %v45_v31 = vld [vmem:[%s937_s1 + $0xb8] sm:$0xff] }
   0xb   :  { %486 = vmatpush3.msra.mxu1 %v66_v16  ;;  %453 = vmatpush3.msra.mxu0 %v33_v17  ;;  %v63_v28 = vld [vmem:[%s937_s1 + $0x148] sm:$0xff]  ;;  %v78_v30 = vld [vmem:[%s937_s1 + $0x1c0] sm:$0xff]  ;;  %v29_v33 = vld [vmem:[%s937_s1 + $0x38] sm:$0xff] }
   0xc   :  { %487 = vmatprep.subr.mxu1 %v81_v18  ;;  %454 = vmatprep.subr.mxu0 %v48_v19  ;;  %v62_v32 = vld [vmem:[%s937_s1 + $0x140] sm:$0xff]  ;;  %v77_v34 = vld [vmem:[%s937_s1 + $0x1b8] sm:$0xff]  ;;  %v44_v35 = vld [vmem:[%s937_s1 + $0xb0] sm:$0xff] }
   0xd   :  { %488 = vmatpush3.msra.mxu1 %v65_v20  ;;  %455 = vmatpush3.msra.mxu0 %v32_v21  ;;  %v61_v36 = vld [vmem:[%s937_s1 + $0x138] sm:$0xff]  ;;  %v28_v37 = vld [vmem:[%s937_s1 + $0x30] sm:$0xff]  ;;  %v43_v39 = vld [vmem:[%s937_s1 + $0xa8] sm:$0xff] }
   0xe   :  { %489 = vmatprep.subr.mxu1 %v80_v22  ;;  %456 = vmatprep.subr.mxu0 %v47_v23  ;;  %v76_v38 = vld [vmem:[%s937_s1 + $0x1b0] sm:$0xff]  ;;  %v27_v41 = vld [vmem:[%s937_s1 + $0x28] sm:$0xff]  ;;  %v42_v43 = vld [vmem:[%s937_s1 + $0xa0] sm:$0xff] }
   0xf   :  { %490 = vmatpush3.msra.mxu1 %v64_v24  ;;  %457 = vmatpush3.msra.mxu0 %v31_v25  ;;  %v60_v40 = vld [vmem:[%s937_s1 + $0x130] sm:$0xff]  ;;  %v75_v42 = vld [vmem:[%s937_s1 + $0x1a8] sm:$0xff]  ;;  %v26_v45 = vld [vmem:[%s937_s1 + $0x20] sm:$0xff] }
  0x10   :  { %491 = vmatprep.subr.mxu1 %v79_v26  ;;  %458 = vmatprep.subr.mxu0 %v46_v27  ;;  %v59_v44 = vld [vmem:[%s937_s1 + $0x128] sm:$0xff]  ;;  %v74_v46 = vld [vmem:[%s937_s1 + $0x1a0] sm:$0xff]  ;;  %v41_v47 = vld [vmem:[%s937_s1 + $0x98] sm:$0xff] }
  0x11   :  { %492 = vmatpush3.msra.mxu1 %v63_v28  ;;  %459 = vmatpush3.msra.mxu0 %v30_v29  ;;  %v58_v48 = vld [vmem:[%s937_s1 + $0x120] sm:$0xff]  ;;  %v25_v49 = vld [vmem:[%s937_s1 + $0x18] sm:$0xff]  ;;  %v40_v51 = vld [vmem:[%s937_s1 + $0x90] sm:$0xff] }
  0x12   :  { %493 = vmatprep.subr.mxu1 %v78_v30  ;;  %460 = vmatprep.subr.mxu0 %v45_v31  ;;  %v73_v50 = vld [vmem:[%s937_s1 + $0x198] sm:$0xff]  ;;  %v24_v53 = vld [vmem:[%s937_s1 + $0x10] sm:$0xff]  ;;  %v39_v55 = vld [vmem:[%s937_s1 + $0x88] sm:$0xff] }
  0x13   :  { %494 = vmatpush3.msra.mxu1 %v62_v32  ;;  %461 = vmatpush3.msra.mxu0 %v29_v33  ;;  %v57_v52 = vld [vmem:[%s937_s1 + $0x118] sm:$0xff]  ;;  %v72_v54 = vld [vmem:[%s937_s1 + $0x190] sm:$0xff]  ;;  %v23_v57 = vld [vmem:[%s937_s1 + $0x8] sm:$0xff] }
  0x14   :  { %495 = vmatprep.subr.mxu1 %v77_v34  ;;  %462 = vmatprep.subr.mxu0 %v44_v35  ;;  %v56_v56 = vld [vmem:[%s937_s1 + $0x110] sm:$0xff]  ;;  %v71_v58 = vld [vmem:[%s937_s1 + $0x188] sm:$0xff]  ;;  %v38_v59 = vld [vmem:[%s937_s1 + $0x80] sm:$0xff] }
  0x15   :  { %496 = vmatpush3.msra.mxu1 %v61_v36  ;;  %463 = vmatpush3.msra.mxu0 %v28_v37  ;;  %v16_v60 = vld [vmem:[%s936_s0 + $0x8] sm:$0xff]  ;;  %v22_v61 = vld [vmem:[%s937_s1] sm:$0xff]  ;;  %v117_v1 = vld [vmem:[%s937_s1 + $0x2f8] sm:$0xff] }
  0x16   :  { %497 = vmatprep.subr.mxu1 %v76_v38  ;;  %464 = vmatprep.subr.mxu0 %v43_v39  ;;  %v55_v62 = vld [vmem:[%s937_s1 + $0x108] sm:$0xff]  ;;  %v15_v63 = vld [vmem:[%s936_s0] sm:$0xff]  ;;  %v18_v3 = vld [vmem:[%s936_s0 + $0x18] sm:$0xff] }
  0x17   :  { %498 = vmatpush3.msra.mxu1 %v60_v40  ;;  %465 = vmatpush3.msra.mxu0 %v27_v41  ;;  %v70_v0 = vld [vmem:[%s937_s1 + $0x180] sm:$0xff]  ;;  %v101_v4 = vld [vmem:[%s937_s1 + $0x278] sm:$0xff]  ;;  %v17_v5 = vld [vmem:[%s936_s0 + $0x10] sm:$0xff] }
  0x18   :  { %499 = vmatprep.subr.mxu1 %v75_v42  ;;  %466 = vmatprep.subr.mxu0 %v42_v43  ;;  %v54_v2 = vld [vmem:[%s937_s1 + $0x100] sm:$0xff]  ;;  %v116_v6 = vld [vmem:[%s937_s1 + $0x2f0] sm:$0xff]  ;;  %v20_v8 = vld [vmem:[%s936_s0 + $0x28] sm:$0xff] }
  0x19   :  { %500 = vmatpush3.msra.mxu1 %v59_v44  ;;  %467 = vmatpush3.msra.mxu0 %v26_v45  ;;  %v100_v7 = vld [vmem:[%s937_s1 + $0x270] sm:$0xff]  ;;  %v115_v9 = vld [vmem:[%s937_s1 + $0x2e8] sm:$0xff] }
  0x1a   :  { %501 = vmatprep.subr.mxu1 %v74_v46  ;;  %468 = vmatprep.subr.mxu0 %v41_v47 }
  0x1b   :  { %502 = vmatpush3.msra.mxu1 %v58_v48  ;;  %469 = vmatpush3.msra.mxu0 %v25_v49 }
  0x1c   :  { %503 = vmatprep.subr.mxu1 %v73_v50  ;;  %470 = vmatprep.subr.mxu0 %v40_v51 }
  0x1d   :  { %504 = vmatpush3.msra.mxu1 %v57_v52  ;;  %471 = vmatpush3.msra.mxu0 %v24_v53 }
  0x1e   :  { %505 = vmatprep.subr.mxu1 %v72_v54  ;;  %472 = vmatprep.subr.mxu0 %v39_v55 }
  0x1f   :  { %506 = vmatpush3.msra.mxu1 %v56_v56  ;;  %473 = vmatpush3.msra.mxu0 %v23_v57 }
  0x20   :  { %507 = vmatprep.subr.mxu1 %v71_v58  ;;  %474 = vmatprep.subr.mxu0 %v38_v59 }
  0x21   :  { %195 = vmatprep.mubr.f32.mxu0 %v16_v60  ;;  %475 = vmatpush3.msra.mxu0 %v22_v61 }
  0x22   :  { %508 = vmatpush3.msra.mxu1 %v55_v62  ;;  %196 = vmatmul.mubr.f32.vlgmr.msra.gmra.mxu0 %v15_v63 }
  0x23   :  { %509 = vmatprep.subr.mxu1 %v70_v0  ;;  %514 = vmatprep.subr.mxu0 %v117_v1 }
  0x24   :  { %510 = vmatpush3.msra.mxu1 %v54_v2  ;;  %265 = vmatprep.mubr.f32.mxu1 %v18_v3 }
  0x25   :  { %515 = vmatpush3.msra.mxu0 %v101_v4 }
  0x26   :  { %8 = vsyncpa [#allocation3], 0  ;;  %266 = vmatmul.mubr.f32.vlgmr.msra.gmra.mxu1 %v17_v5  ;;  %516 = vmatprep.subr.mxu0 %v116_v6  ;;  %v99_v10 = vld [vmem:[%s937_s1 + $0x268] sm:$0xff]  ;;  %v114_v12 = vld [vmem:[%s937_s1 + $0x2e0] sm:$0xff]  ;;  %v592_v14 = vmov 0.0   ;;  %vm127_vm0 = vcmask 130048  }
  0x27   :  { %v119_v11 = vld [vmem:[%s937_s1 + $0x308] sm:$0xff]  ;;  %517 = vmatpush3.msra.mxu0 %v100_v7  ;;  %335 = vmatprep.mubr.f32.mxu0 %v20_v8  ;;  %v98_v13 = vld [vmem:[%s937_s1 + $0x260] sm:$0xff]  ;;  %v113_v16 = vld [vmem:[%s937_s1 + $0x2d8] sm:$0xff]  ;;  %vm593_vm1 = vmmov 0   ;;  %vm419_vm2 = vcmask 80896  }
  0x28   :  { %518 = vmatprep.subr.mxu0 %v115_v9  ;;  %552 = vmatprep.subr.mxu1 %v592_v14  ;;  %v118_v15 = vld [vmem:[%s937_s1 + $0x300] sm:$0xff]  ;;  %v97_v17 = vld [vmem:[%s937_s1 + $0x258] sm:$0xff]  ;;  %v21_v18 = vld [vmem:[%s936_s0 + $0x30] sm:$0xff] }
  0x29   :  { %519 = vmatpush3.msra.mxu0 %v99_v10  ;;  %553 = vmatpush3.msra.mxu1 %v119_v11  ;;  %v112_v19 = vld [vmem:[%s937_s1 + $0x2d0] sm:$0xff]  ;;  %v111_v21 = vld [vmem:[%s937_s1 + $0x2c8] sm:$0xff]  ;;  %v110_v23 = vld [vmem:[%s937_s1 + $0x2c0] sm:$0xff] }
  0x2a   :  { %520 = vmatprep.subr.mxu0 %v114_v12  ;;  %554 = vmatprep.subr.mxu1 %v592_v14  ;;  %v96_v20 = vld [vmem:[%s937_s1 + $0x250] sm:$0xff]  ;;  %v95_v22 = vld [vmem:[%s937_s1 + $0x248] sm:$0xff]  ;;  %v94_v24 = vld [vmem:[%s937_s1 + $0x240] sm:$0xff] }
  0x2b   :  { %521 = vmatpush3.msra.mxu0 %v98_v13  ;;  %555 = vmatpush3.msra.mxu1 %v118_v15  ;;  %v109_v25 = vld [vmem:[%s937_s1 + $0x2b8] sm:$0xff]  ;;  %v108_v27 = vld [vmem:[%s937_s1 + $0x2b0] sm:$0xff]  ;;  %v107_v29 = vld [vmem:[%s937_s1 + $0x2a8] sm:$0xff] }
  0x2c   :  { %522 = vmatprep.subr.mxu0 %v113_v16  ;;  %556 = vmatprep.mubr.msk.f32.mxu1 %vm593_vm1, %v592_v14  ;;  %v93_v26 = vld [vmem:[%s937_s1 + $0x238] sm:$0xff]  ;;  %v92_v28 = vld [vmem:[%s937_s1 + $0x230] sm:$0xff]  ;;  %v91_v30 = vld [vmem:[%s937_s1 + $0x228] sm:$0xff] }
  0x2d   :  { %523 = vmatpush3.msra.mxu0 %v97_v17  ;;  %557 = vmatmul.mubr.msk.f32.vlgmr.msra.gmra.mxu1 %vm127_vm0, %v21_v18  ;;  %v106_v31 = vld [vmem:[%s937_s1 + $0x2a0] sm:$0xff]  ;;  %v105_v33 = vld [vmem:[%s937_s1 + $0x298] sm:$0xff]  ;;  %v104_v35 = vld [vmem:[%s937_s1 + $0x290] sm:$0xff] }
  0x2e   :  { %524 = vmatprep.subr.mxu0 %v112_v19  ;;  %v90_v32 = vld [vmem:[%s937_s1 + $0x220] sm:$0xff]  ;;  %v89_v34 = vld [vmem:[%s937_s1 + $0x218] sm:$0xff]  ;;  %v88_v36 = vld [vmem:[%s937_s1 + $0x210] sm:$0xff] }
  0x2f   :  { %525 = vmatpush3.msra.mxu0 %v96_v20  ;;  %v103_v37 = vld [vmem:[%s937_s1 + $0x288] sm:$0xff]  ;;  %v102_v39 = vld [vmem:[%s937_s1 + $0x280] sm:$0xff] }
  0x30   :  { %526 = vmatprep.subr.mxu0 %v111_v21  ;;  %v87_v38 = vld [vmem:[%s937_s1 + $0x208] sm:$0xff]  ;;  %v86_v40 = vld [vmem:[%s937_s1 + $0x200] sm:$0xff] }
  0x31   :  { %527 = vmatpush3.msra.mxu0 %v95_v22  ;;  %v19_v41 = vld [vmem:[%s936_s0 + $0x20] sm:$0xff]  ;;  %s594_s0 = smov [#allocation2]  }
  0x32   :  { %528 = vmatprep.subr.mxu0 %v110_v23  ;;  %v441_v49 = vld [vmem:[%s938_s2] ss:$0 sm:$0xff]  ;;  %s433_s1 = sshll.u32 %s594_s0, 4  ;;  %s434_s1 = int_to_ptr.vmem [resolvable:$true] %s433_s1 }
  0x33   :  { %529 = vmatpush3.msra.mxu0 %v94_v24  ;;  %s570_s2 = scalar_lea.vmem %s434_s1, 128  ;;  %p575_p1 = scmp.lt.s32.totalorder %s434_s1, %s434_s1 }
  0x34   :  { %530 = vmatprep.subr.mxu0 %v109_v25  ;;  %p571_p0 = scmp.ne.s32.totalorder %s434_s1, %s570_s2  ;;  %p576_p2 = scmp.lt.s32.totalorder %s570_s2, %s570_s2 }
  0x35   :  { %531 = vmatpush3.msra.mxu0 %v93_v26 }
  0x36   :  { %532 = vmatprep.subr.mxu0 %v108_v27  ;;  %p577_p3 = por %p576_p2, %p575_p1 }
  0x37   :  { %533 = vmatpush3.msra.mxu0 %v92_v28 }
  0x38   :  { %534 = vmatprep.subr.mxu0 %v107_v29  ;;  %p578_p4 = pnand %p577_p3, %p571_p0 }
  0x39   :  { %535 = vmatpush3.msra.mxu0 %v91_v30 }
  0x3a   :  { %536 = vmatprep.subr.mxu0 %v106_v31 }
  0x3b   :  { %537 = vmatpush3.msra.mxu0 %v90_v32 }
  0x3c   :  { %538 = vmatprep.subr.mxu0 %v105_v33 }
  0x3d   :  { %539 = vmatpush3.msra.mxu0 %v89_v34 }
  0x3e   :  { %540 = vmatprep.subr.mxu0 %v104_v35 }
  0x3f   :  { %541 = vmatpush3.msra.mxu0 %v88_v36 }
  0x40   :  { %542 = vmatprep.subr.mxu0 %v103_v37 }
  0x41   :  { %543 = vmatpush3.msra.mxu0 %v87_v38 }
  0x42   :  { %544 = vmatprep.subr.mxu0 %v102_v39 }
  0x43   :  { %545 = vmatpush3.msra.mxu0 %v86_v40 }
  0x44   :  { %336 = vmatmul.mubr.f32.vlgmr.msra.gmra.mxu0 %v19_v41 }
  0xe2   :  { %v476_v46 = vpop.f32.mrf.mxu0 }
  0xe4   :  { %v477_v47 = vpop.f32.mrf.mxu0 }
  0xe5   :  { %v478_v48 = vadd.f32 %v477_v47, %v476_v46 }
  0xe6   :  { %v511_v42 = vpop.f32.mrf.mxu1 }
  0xe7   :  { %v198_v50 = vadd.f32 %v478_v48, %v441_v49 }
  0xe8   :  { %v512_v43 = vpop.f32.mrf.mxu1 }
  0xe9   :  { %v513_v51 = vadd.f32 %v512_v43, %v511_v42 }
  0xeb   :  { %v268_v54 = vadd.f32 %v513_v51, %v198_v50 }
  0xed   :  { %v407_v44 = vpop.f32.mrf.mxu1 }
  0xef   :  { %v558_v45 = vpop.f32.mrf.mxu1 }
 0x104   :  { %v546_v52 = vpop.f32.mrf.mxu0 }
 0x106   :  { %v547_v53 = vpop.f32.mrf.mxu0 }
 0x107   :  { %v548_v55 = vadd.f32 %v547_v53, %v546_v52 }
 0x109   :  { %v338_v56 = vadd.f32 %v548_v55, %v268_v54 }
 0x10b   :  { %v408_v57 = vadd.f32 %v407_v44, %v338_v56 }
 0x10d   :  { %v443_v58 = vmul.f32 -1.442695, %v408_v57 }
 0x10f   :  { %562 = vpow2.f32 %v443_v58 }
 0x11c   :  { %v563_v59 = vpop.eup %562 }
 0x11d   :  { %v414_v60 = vadd.f32 1.0, %v563_v59 }
 0x11f   :  { %564 = vrcp.f32 %v414_v60 }
 0x12c   :  { %v565_v61 = vpop.eup %564 }
 0x12d   :  { %v417_v62 = vmul.f32 1.442695, %v565_v61 }
 0x12f   :  { %566 = vpow2.f32 %v417_v62 }
 0x13c   :  { %v567_v63 = vpop.eup %566 }
 0x13d   :  { %v420_v0 = vsel %vm419_vm2, %v567_v63, 0.0 }
 0x13e   :  { %421 = vadd.xlane.f32.xlu0 %v420_v0 }
 0x1c7   :  { %v422_v1 = vpop.xlane.xlu0 %421 }
 0x1c8   :  { %568 = vlog2.f32 %v422_v1 }
 0x1d5   :  { %v569_v2 = vpop.eup %568 }
 0x1d6   :  { %v424_v3 = vmul.f32 0.6931472, %v569_v2 }
 0x1d8   :  { %v425_v4 = vsub.f32 %v565_v61, %v424_v3 }
 0x1da   :  { %426 = vst.msk [vmem:[#allocation2] sm:$0xff] %vm419_vm2, %v425_v4 }
 0x1db   :  { %581 = shalt.err (!%p578_p4)
}
 0x1dc   :  { %436 = dma.vmem_to_hbm [thread:$0]  %s434_s1, 128, %s939_s3, [#allocation3]  }
 0x1dd   :  { %590 = dma.done.wait [#allocation3], 128  }
 0x1de   :  { %591 = vsyncadd [#allocation3], 4294967168 }
 0x1df   :  { %440 = vsyncpa [#allocation3], 1 }

</bundles_post_ra>
